<compile_context>
chip_gen: v7x
topology: tpu7x:2x2x1
jax: 0.10.0
libtpu: 0.0.40
codegen_flags: <defaults>
</compile_context>

<pallas_src>
import math

import numpy as np
import jax
import jax.numpy as jnp
from jax.experimental import pallas as pl
from jax.experimental.pallas import tpu as pltpu


def make_positional_encoding(max_len: int, d_model: int, dtype=jnp.float32):
    """Deterministic sinusoidal table matching the PyTorch __init__ exactly
    (including its log(100000.0) constant)."""
    position = jnp.arange(max_len, dtype=jnp.float32)[:, None]              # (L, 1)
    div_term = jnp.exp(
        jnp.arange(0, d_model, 2, dtype=jnp.float32) * (-math.log(100000.0) / d_model)
    )                                                                       # (D/2,)
    ang = position * div_term                                               # (L, D/2)
    pe = jnp.zeros((max_len, d_model), dtype=jnp.float32)
    pe = pe.at[:, 0::2].set(jnp.sin(ang))
    pe = pe.at[:, 1::2].set(jnp.cos(ang))
    return pe.astype(dtype)


def _make_kernel(training: bool, p: float, seed: int):
    """out = x + pe (plus inverted dropout when training).

    All constants below are Python ints / numpy scalars -> they become jaxpr
    literals inside the kernel, NOT captured jax.Array constants.
    """
    drop_thresh = int(min(int(round(p * (1 << 31))), (1 << 31) - 1))
    inv_keep = float(1.0 / (1.0 - p)) if p < 1.0 else 0.0
    seed_mix = int((seed * 0x9E3779B9 + 0x85EBCA6B) & 0xFFFFFFFF)

    def kernel(x_ref, pe_ref, o_ref):
        y = x_ref[...] + pe_ref[...]
        if training and p > 0.0:
            bm, bw = y.shape                      # static block shape
            row0 = pl.program_id(0) * bm
            rows = jax.lax.broadcasted_iota(jnp.int32, (bm, bw), 0) + row0
            cols = jax.lax.broadcasted_iota(jnp.int32, (bm, bw), 1)
            # Counter-based hash of the global flat element index:
            # independent of tiling / grid layout, so no per-tile stream reuse.
            idx = (rows * bw + cols).astype(jnp.uint32)
            h = idx * np.uint32(0x9E3779B1) + np.uint32(seed_mix)
            h = h ^ (h >> 16)
            h = h * np.uint32(0x85EBCA6B)
            h = h ^ (h >> 13)
            h = h * np.uint32(0xC2B2AE35)
            h = h ^ (h >> 16)
            bits31 = (h >> 1).astype(jnp.int32)   # uniform in [0, 2^31)
            keep = bits31 >= np.int32(drop_thresh)
            y = jnp.where(keep, y * np.float32(inv_keep), jnp.zeros_like(y))
        o_ref[...] = y.astype(o_ref.dtype)

    return kernel


def _pick_block_rows(num_rows: int, row_bytes: int, target_bytes: int = 2 << 20) -> int:
    """Rows per block: multiple of 8, ~target_bytes per stream, grid >= 2 when
    there is enough work (so the 'parallel' axis can shard across v7x's 2 TCs)."""
    r_pad = ((num_rows + 7) // 8) * 8
    br = max(8, (target_bytes // max(row_bytes, 1)) // 8 * 8)
    br = min(br, r_pad)
    if br >= r_pad and num_rows > 8:
        br = max(8, (((num_rows + 1) // 2) + 7) // 8 * 8)
    return br


def positional_encoder(x, pe, *, training: bool = False, p: float = 0.1,
                       seed: int = 0, block_rows: int | None = None):
    """Pallas implementation of PositionalEncoder.forward.

    x  : (S, D) activations
    pe : (max_len, D) sinusoidal buffer (max_len >= S); passed whole, only the
         first S rows are ever DMA'd.
    training=False reproduces eval-mode Dropout (identity).
    """
    S, D = x.shape
    L, Dp = pe.shape
    assert Dp == D and L >= S

    # Lane-dense view: if D is not a multiple of 128 but both arrays flatten
    # cleanly into 128-wide rows, present the kernel with a 128-lane layout so
    # stores are full-vreg (the op is elementwise, so the reshape is free).
    if D % 128 != 0 and (S * D) % 128 == 0 and (L * D) % 128 == 0:
        W = 128
        xv = x.reshape(S * D // W, W)
        pev = pe.reshape(L * D // W, W)
    else:
        W = D
        xv, pev = x, pe

    R = xv.shape[0]
    if block_rows is None:
        block_rows = _pick_block_rows(R, W * x.dtype.itemsize)
    block_rows = max(8, (block_rows // 8) * 8)

    grid = (pl.cdiv(R, block_rows),)

    out = pl.pallas_call(
        _make_kernel(training, p, seed),
        out_shape=jax.ShapeDtypeStruct((R, W), x.dtype),
        grid=grid,
        in_specs=[
            pl.BlockSpec((block_rows, W), lambda i: (i, 0)),   # x tile
            pl.BlockSpec((block_rows, W), lambda i: (i, 0)),   # pe tile (full buffer, first S rows only)
        ],
        out_specs=pl.BlockSpec((block_rows, W), lambda i: (i, 0)),
        input_output_aliases={0: 0},   # out aliases x (same tile index each step)
        compiler_params=pltpu.CompilerParams(
            dimension_semantics=("parallel",),
            vmem_limit_bytes=32 * 1024 * 1024,  # safe on v5e/v6e/v7x; headroom for big tiles
        ),
    )(xv, pev)
    return out.reshape(S, D)


if __name__ == "__main__":
    d_model = 32
    seq_len = 16
    max_len = 64          # small stand-in for max_len=5000 (same construction)

    key = jax.random.PRNGKey(0)
    x = jax.random.normal(key, (seq_len, d_model), dtype=jnp.float32)
    pe = make_positional_encoding(max_len, d_model)

    # Eval-mode forward (dropout = identity) -- deterministic, checkable.
    out = jax.block_until_ready(positional_encoder(x, pe, training=False))
    ref = x + pe[:seq_len, :]
    assert out.shape == x.shape and out.dtype == x.dtype
    assert jnp.allclose(out, ref, atol=1e-6, rtol=1e-6)

    # Training path: kept elements must equal ref/(1-p); some elements dropped.
    out_tr = jax.block_until_ready(positional_encoder(x, pe, training=True, seed=123))
    kept = out_tr != 0.0
    err = jnp.where(kept, out_tr - ref / 0.9, 0.0)
    assert float(jnp.max(jnp.abs(err))) < 1e-5
    drop_frac = 1.0 - float(jnp.mean(kept.astype(jnp.float32)))
    assert 0.0 < drop_frac < 0.35

    print("KERNEL_OK")
</pallas_src>

<mosaic_0001>
module attributes {stable_mosaic.version = 11 : i64} {
  func.func @kernel(%arg0: i32, %arg1: memref<8x128xf32, #tpu.memory_space<vmem>>, %arg2: memref<8x128xf32, #tpu.memory_space<vmem>>, %arg3: memref<8x128xf32, #tpu.memory_space<vmem>>) attributes {dimension_semantics = [#tpu.dimension_semantics<parallel>], iteration_bounds = array<i64: 1>, scalar_prefetch = 0 : i64, scratch_operands = 0 : i64, tpu.core_type = #tpu.core_type<tc>, window_params = [{transform_indices = @transform_0, window_bounds = array<i64: 8, 128>}, {transform_indices = @transform_1, window_bounds = array<i64: 8, 128>}, {transform_indices = @transform_2, window_bounds = array<i64: 8, 128>}]} {
    %c0 = arith.constant 0 : index
    %c0_0 = arith.constant 0 : index
    %0 = vector.load %arg1[%c0, %c0_0] : memref<8x128xf32, #tpu.memory_space<vmem>>, vector<8x128xf32>
    %c0_1 = arith.constant 0 : index
    %c0_2 = arith.constant 0 : index
    %1 = vector.load %arg2[%c0_1, %c0_2] : memref<8x128xf32, #tpu.memory_space<vmem>>, vector<8x128xf32>
    %2 = arith.addf %0, %1 : vector<8x128xf32>
    %c0_3 = arith.constant 0 : index
    %c0_4 = arith.constant 0 : index
    %3 = vector.load %arg3[%c0_3, %c0_4] : memref<8x128xf32, #tpu.memory_space<vmem>>, vector<8x128xf32>
    tpu.vector_store %arg3[%c0_3, %c0_4], %2 {strides = array<i32>} : memref<8x128xf32, #tpu.memory_space<vmem>>, vector<8x128xf32>,
    return
  }
  func.func @transform_0(%arg0: i32) -> (i32, i32) {
    %c0_i32 = arith.constant 0 : i32
    %c0_i32_0 = arith.constant 0 : i32
    return %arg0, %c0_i32 : i32, i32
  }
  func.func @transform_1(%arg0: i32) -> (i32, i32) {
    %c0_i32 = arith.constant 0 : i32
    %c0_i32_0 = arith.constant 0 : i32
    return %arg0, %c0_i32 : i32, i32
  }
  func.func @transform_2(%arg0: i32) -> (i32, i32) {
    %c0_i32 = arith.constant 0 : i32
    %c0_i32_0 = arith.constant 0 : i32
    return %arg0, %c0_i32 : i32, i32
  }
}

</mosaic_0001>

<bundles_post_ra>
// kernel: tpu_custom_call.1
= control target key start
LH: loop header
LB: loop body
LE: loop exit
PB: predicated region body
PF: predicated region fallthrough
CT: control target
= control target key end

     0   :  { %7 = vsyncpa [#allocation3], 0  ;;  %s202_s0 = inlined_call_operand.hbm [shape: f32[4,128], index: 0, kind: input, shape index: {}, may-alias: {0,2}]   ;;  %s203_s1 = inlined_call_operand.hbm [shape: f32[16,128], index: 1, kind: input, shape index: {}]   ;;  %s204_s2 = inlined_call_operand.hbm [shape: f32[4,128], index: 2, kind: output, shape index: {}, may-alias: {0,2}]  }
   0x1   :  { %8 = vsyncpa [#allocation6], 0 }
   0x2   :  { %9 = vsyncpa [#allocation4], 0 }
   0x3   :  { %14 = vsyncadd [#allocation3], 64  ;;  %s137_s9 = smov [#allocation2]   ;;  %s65_s13 = scalar_lea.hbm %s202_s0, 64 }
   0x4   :  { %s15_s10 = sshll.u32 %s137_s9, 4  ;;  %p66_p0 = scmp.ne.s32.totalorder %s202_s0, %s65_s13  ;;  %s16_s10 = int_to_ptr.vmem [resolvable:$true] %s15_s10 }
   0x5   :  { %p69_p1 = scmp.lt.u32.totalorder %s65_s13, %s202_s0 }
   0x7   :  { %p71_p2 = pnand %p69_p1, %p66_p0 }
   0x9   :  { %74 = shalt.err (!%p71_p2)
}
   0xa   :  { %s75_s18 = scalar_lea.vmem %s16_s10, 64  ;;  %s79_s19 = scalar_lea.vmem %s16_s10, 128 }
   0xb   :  { %p76_p3 = scmp.ne.s32.totalorder %s16_s10, %s75_s18  ;;  %p80_p4 = scmp.lt.s32.totalorder %s16_s10, %s16_s10 }
   0xc   :  { %p81_p5 = scmp.lt.s32.totalorder %s79_s19, %s75_s18 }
   0xe   :  { %p82_p6 = por %p81_p5, %p80_p4 }
  0x10   :  { %p83_p7 = pnand %p82_p6, %p76_p3 }
  0x12   :  { %86 = shalt.err (!%p83_p7)
}
  0x13   :  { %s138_s20 = smov 64   ;;  %s139_s21 = smov 4  }
  0x14   :  { %21 = dma.hbm_to_vmem [thread:$0]  %s202_s0, 64, %s16_s10, [#allocation3], %s138_s20, %s138_s20, %s139_s21  }
  0x15   :  { %s140_s24 = smov [#allocation5]   ;;  %s87_s28 = scalar_lea.hbm %s203_s1, 128 }
  0x16   :  { %s28_s25 = sshll.u32 %s140_s24, 4  ;;  %p88_p8 = scmp.ne.s32.totalorder %s203_s1, %s87_s28  ;;  %s29_s25 = int_to_ptr.vmem [resolvable:$true] %s28_s25 }
  0x17   :  { %s89_s5 = scalar_lea.hbm %s203_s1, 256  ;;  %p91_p10 = scmp.lt.u32.totalorder %s87_s28, %s203_s1 }
  0x18   :  { %p90_p9 = scmp.lt.u32.totalorder %s89_s5, %s87_s28 }
  0x1a   :  { %p92_p11 = por %p91_p10, %p90_p9 }
  0x1c   :  { %p93_p12 = pnand %p92_p11, %p88_p8 }
  0x1e   :  { %96 = shalt.err (!%p93_p12)
}
  0x1f   :  { %s97_s0 = scalar_lea.vmem %s29_s25, 128  ;;  %p102_p0 = scmp.lt.s32.totalorder %s29_s25, %s29_s25 }
  0x20   :  { %p98_p13 = scmp.ne.s32.totalorder %s29_s25, %s97_s0  ;;  %p103_p1 = scmp.lt.s32.totalorder %s97_s0, %s97_s0 }
  0x22   :  { %p104_p2 = por %p103_p1, %p102_p0 }
  0x24   :  { %p105_p3 = pnand %p104_p2, %p98_p13 }
  0x26   :  { %108 = shalt.err (!%p105_p3)
}
  0x27   :  { %31 = dma.hbm_to_vmem [thread:$0]  %s203_s1, 128, %s29_s25, [#allocation6]  }
  0x28   :  { %131 = dma.done.wait [#allocation3], 128  }
  0x29   :  { %132 = vsyncadd [#allocation3], 4294967168 }
  0x2a   :  { %133 = dma.done.wait [#allocation6], 128  }
  0x2b   :  { %134 = vsyncadd [#allocation6], 4294967168  ;;  %v38_v0 = vld [vmem:[#allocation2] sm:$0xff]  ;;  %v39_v1 = vld [vmem:[#allocation5] sm:$0xff] }
  0x2c   :  { %v40_v2 = vadd.f32 %v39_v1, %v38_v0 }
  0x2e   :  { %41 = vst [vmem:[#allocation7] sm:$0xff] %v40_v2 }
  0x2f   :  { %46 = vsyncadd [#allocation4], 64  ;;  %s141_s10 = smov [#allocation7]  }
  0x30   :  { %s47_s11 = sshll.u32 %s141_s10, 4  ;;  %s48_s11 = int_to_ptr.vmem [resolvable:$true] %s47_s11 }
  0x31   :  { %s109_s12 = scalar_lea.vmem %s48_s11, 64  ;;  %s113_s13 = scalar_lea.vmem %s48_s11, 128 }
  0x32   :  { %p110_p4 = scmp.ne.s32.totalorder %s48_s11, %s109_s12  ;;  %p114_p5 = scmp.lt.s32.totalorder %s48_s11, %s48_s11 }
  0x33   :  { %p115_p6 = scmp.lt.s32.totalorder %s113_s13, %s109_s12 }
  0x35   :  { %p116_p7 = por %p115_p6, %p114_p5 }
  0x37   :  { %p117_p8 = pnand %p116_p7, %p110_p4 }
  0x39   :  { %120 = shalt.err (!%p117_p8)
}
  0x3a   :  { %s121_s15 = scalar_lea.hbm %s204_s2, 64 }
  0x3b   :  { %p122_p9 = scmp.ne.s32.totalorder %s204_s2, %s121_s15  ;;  %p125_p10 = scmp.lt.u32.totalorder %s121_s15, %s204_s2 }
  0x3d   :  { %p127_p11 = pnand %p125_p10, %p122_p9 }
  0x3f   :  { %130 = shalt.err (!%p127_p11)
}
  0x40   :  { %53 = dma.vmem_to_hbm [thread:$0]  %s48_s11, 64, %s204_s2, [#allocation4], %s138_s20, %s138_s20, %s139_s21  }
  0x41   :  { %135 = dma.done.wait [#allocation4], 128  }
  0x42   :  { %136 = vsyncadd [#allocation4], 4294967168 }
  0x43   :  { %57 = vsyncpa [#allocation3], 1 }
  0x44   :  { %58 = vsyncpa [#allocation6], 1 }
  0x45   :  { %59 = vsyncpa [#allocation4], 1 }

</bundles_post_ra>
